<compile_context>
chip_gen: v5e
topology: v5e:2x2
jax: 0.10.0
libtpu: 0.0.40
codegen_flags: <defaults>
</compile_context>

<pallas_src>
import functools

import jax
import jax.numpy as jnp
from jax.experimental import pallas as pl
from jax.experimental.pallas import tpu as pltpu

BN_EPS = 1e-5
INPLANES = 64          # conv1 output channels
CONV_K = 7
CONV_STRIDE = 2
CONV_PAD = 3
POOL_K = 3
POOL_STRIDE = 2
POOL_PAD = 1


# ----------------------------------------------------------------------------
# Fused Pallas kernel: conv1 (one big-K matmul) + bias + ReLU + separable
# maxpool.  One grid step == one batch image.
# ----------------------------------------------------------------------------
def stem_kernel(p_ref, w_ref, bias_ref, out_ref, rowbuf_ref, colbuf_ref, *,
                conv_h, conv_w, out_h, out_w):
    cout = w_ref.shape[-1]

    # 7x7/s2 conv folded into one matmul (BN scale pre-folded into weights):
    # [conv_h*conv_w, K] x [K, cout], bf16 operands, f32 MXU accumulation.
    y = jnp.dot(p_ref[...], w_ref[...], preferred_element_type=jnp.float32)
    # BN bias + ReLU epilogue in f32.
    y = jnp.maximum(y + bias_ref[...], 0.0)

    # --------------------------------------------------------------------
    # Separable MaxPool2d(kernel=3, stride=2, padding=1).  ReLU output >= 0,
    # so zero halos are equivalent to PyTorch's implicit -inf padding.
    # --------------------------------------------------------------------
    # Row buffer: (conv_h + 2, conv_w, cout); rows 0 and conv_h+1 are the
    # zero top/bottom halo.  Interior store starts at sublane offset 0.
    rowbuf_ref[0, :, :] = jnp.zeros((conv_w, cout), jnp.float32)
    rowbuf_ref[conv_h + 1, :, :] = jnp.zeros((conv_w, cout), jnp.float32)
    rowbuf_ref[1:1 + conv_h, :, :] = y.reshape(conv_h, conv_w, cout)

    # H-pass: cheap row-strided reads (outermost dim -> pure addressing).
    vh = rowbuf_ref[pl.ds(0, out_h, stride=POOL_STRIDE), :, :]
    vh = jnp.maximum(vh, rowbuf_ref[pl.ds(1, out_h, stride=POOL_STRIDE), :, :])
    vh = jnp.maximum(vh, rowbuf_ref[pl.ds(2, out_h, stride=POOL_STRIDE), :, :])

    # Column buffer: (out_h, conv_w + 16, cout).  Interior lives at columns
    # [8, 8+conv_w) so its store is sublane-aligned; 8-wide zero halo strips
    # on each side cover the left (-1) tap and any right overrun.
    colbuf_ref[:, 0:8, :] = jnp.zeros((out_h, 8, cout), jnp.float32)
    colbuf_ref[:, conv_w + 8:conv_w + 16, :] = jnp.zeros((out_h, 8, cout),
                                                         jnp.float32)
    colbuf_ref[:, 8:8 + conv_w, :] = vh

    # W-pass: 3 sublane-strided reads over the (small) out_h x out_w result.
    m = colbuf_ref[:, pl.ds(7, out_w, stride=POOL_STRIDE), :]
    m = jnp.maximum(m, colbuf_ref[:, pl.ds(8, out_w, stride=POOL_STRIDE), :])
    m = jnp.maximum(m, colbuf_ref[:, pl.ds(9, out_w, stride=POOL_STRIDE), :])

    # Lane-dense store: 512-wide last dim -> unmasked vst.
    out_ref[...] = m.reshape(out_h, out_w * cout)


# ----------------------------------------------------------------------------
# Wrapper: im2col in XLA (pure data movement), one pallas_call for everything.
# ----------------------------------------------------------------------------
def _extract_conv_patches(x_nhwc):
    """im2col for conv1 (7x7, stride 2, pad 3): [N,H,W,C] -> [N, Ho*Wo, 49*C].

    Tap order is (ky, kx, cin), matching the flattened HWIO weight layout.
    """
    n, h, w, c = x_nhwc.shape
    ho = (h + 2 * CONV_PAD - CONV_K) // CONV_STRIDE + 1
    wo = (w + 2 * CONV_PAD - CONV_K) // CONV_STRIDE + 1
    xp = jnp.pad(x_nhwc, ((0, 0), (CONV_PAD, CONV_PAD),
                          (CONV_PAD, CONV_PAD), (0, 0)))
    taps = []
    for ky in range(CONV_K):
        for kx in range(CONV_K):
            taps.append(
                xp[:, ky:ky + (ho - 1) * CONV_STRIDE + 1:CONV_STRIDE,
                      kx:kx + (wo - 1) * CONV_STRIDE + 1:CONV_STRIDE, :])
    patches = jnp.concatenate(taps, axis=-1)              # [N, Ho, Wo, 49*C]
    return patches.reshape(n, ho * wo, CONV_K * CONV_K * c), ho, wo


def net_exit2_part1l(params, x_nchw):
    """conv1(7x7,s2,p3,no bias) -> BN -> ReLU -> MaxPool(3,s2,p1); NCHW in/out."""
    x = jnp.transpose(x_nchw, (0, 2, 3, 1)).astype(jnp.float32)   # -> NHWC
    n, _, _, cin = x.shape

    patches, conv_h, conv_w = _extract_conv_patches(x)
    k = CONV_K * CONV_K * cin
    patches = patches.astype(jnp.bfloat16)        # bf16 matmul operands

    # Fold the inference-mode BN scale into the f32 weights, then cast bf16.
    w = (params["w_hwio"].reshape(k, INPLANES) * params["scale"]
         ).astype(jnp.bfloat16)

    out_h = (conv_h + 2 * POOL_PAD - POOL_K) // POOL_STRIDE + 1
    out_w = (conv_w + 2 * POOL_PAD - POOL_K) // POOL_STRIDE + 1
    m = conv_h * conv_w

    kernel = functools.partial(stem_kernel, conv_h=conv_h, conv_w=conv_w,
                               out_h=out_h, out_w=out_w)
    # NOTE(v7x/224x224): per-image blocks here are a few MB; for full ResNet
    # resolutions add an M-tile grid axis (row bands with a 1-row pool halo)
    # or raise vmem_limit_bytes to keep 2-deep pipelining under 64 MiB VMEM.
    y = pl.pallas_call(
        kernel,
        out_shape=jax.ShapeDtypeStruct((n, out_h, out_w * INPLANES),
                                       jnp.float32),
        grid_spec=pltpu.PrefetchScalarGridSpec(
            num_scalar_prefetch=0,
            grid=(n,),                            # one image per grid step
            in_specs=[
                pl.BlockSpec((None, m, k), lambda b: (b, 0, 0)),
                pl.BlockSpec((k, INPLANES), lambda b: (0, 0)),
                pl.BlockSpec((1, INPLANES), lambda b: (0, 0)),
            ],
            out_specs=pl.BlockSpec((None, out_h, out_w * INPLANES),
                                   lambda b: (b, 0, 0)),
            scratch_shapes=[
                pltpu.VMEM((conv_h + 2, conv_w, INPLANES), jnp.float32),
                pltpu.VMEM((out_h, conv_w + 16, INPLANES), jnp.float32),
            ],
        ),
        compiler_params=pltpu.CompilerParams(
            dimension_semantics=("parallel",)),   # megacore: images across TCs
    )(patches, w, params["bias"])

    y = y.reshape(n, out_h, out_w, INPLANES)
    return jnp.transpose(y, (0, 3, 1, 2))         # NHWC -> NCHW (PyTorch layout)


# ----------------------------------------------------------------------------
# Parameter init (deterministic, synthetic; BN folded to inference scale/bias)
# ----------------------------------------------------------------------------
def init_params(key):
    k_w, k_g, k_b, k_m, k_v = jax.random.split(key, 5)
    cin = 3
    std = (2.0 / (cin * CONV_K * CONV_K)) ** 0.5
    w_hwio = (jax.random.normal(k_w, (CONV_K, CONV_K, cin, INPLANES)) * std
              ).astype(jnp.float32)
    gamma = jax.random.uniform(k_g, (INPLANES,), minval=0.5, maxval=1.5)
    beta = jax.random.normal(k_b, (INPLANES,)) * 0.1
    mean = jax.random.normal(k_m, (INPLANES,)) * 0.1
    var = jax.random.uniform(k_v, (INPLANES,), minval=0.5, maxval=1.5)
    scale = gamma / jnp.sqrt(var + BN_EPS)
    bias = beta - mean * scale
    return {
        "w_hwio": w_hwio,
        "scale": scale.reshape(1, INPLANES).astype(jnp.float32),
        "bias": bias.reshape(1, INPLANES).astype(jnp.float32),
    }


# ----------------------------------------------------------------------------
# Pure-XLA reference (same bf16 operand rounding and BN folding as the kernel)
# ----------------------------------------------------------------------------
def reference_forward(params, x_nchw):
    x = jnp.transpose(x_nchw, (0, 2, 3, 1)).astype(jnp.float32)
    x = x.astype(jnp.bfloat16).astype(jnp.float32)
    w = (params["w_hwio"] * params["scale"][0]
         ).astype(jnp.bfloat16).astype(jnp.float32)
    y = jax.lax.conv_general_dilated(
        x, w, window_strides=(CONV_STRIDE, CONV_STRIDE),
        padding=((CONV_PAD, CONV_PAD), (CONV_PAD, CONV_PAD)),
        dimension_numbers=("NHWC", "HWIO", "NHWC"),
        precision=jax.lax.Precision.HIGHEST)
    y = jnp.maximum(y + params["bias"][0], 0.0)
    y = jax.lax.reduce_window(
        y, -jnp.inf, jax.lax.max,
        window_dimensions=(1, POOL_K, POOL_K, 1),
        window_strides=(1, POOL_STRIDE, POOL_STRIDE, 1),
        padding=((0, 0), (POOL_PAD, POOL_PAD), (POOL_PAD, POOL_PAD), (0, 0)))
    return jnp.transpose(y, (0, 3, 1, 2))


# ----------------------------------------------------------------------------
if __name__ == "__main__":
    key = jax.random.PRNGKey(0)
    k_x, k_p = jax.random.split(key)

    # NCHW input consistent with the PyTorch module: 3 input channels.
    x = jax.random.normal(k_x, (2, 3, 32, 32), dtype=jnp.float32)
    params = init_params(k_p)

    fwd = jax.jit(net_exit2_part1l)
    out = fwd(params, x)
    jax.block_until_ready(out)

    assert out.shape == (2, INPLANES, 8, 8), out.shape
    assert bool(jnp.all(jnp.isfinite(out)))

    ref = reference_forward(params, x)
    assert bool(jnp.allclose(out, ref, rtol=1e-3, atol=1e-3)), \
        float(jnp.max(jnp.abs(out - ref)))

    print("KERNEL_OK")
</pallas_src>

<mosaic_0001>
module attributes {stable_mosaic.version = 11 : i64} {
  func.func @stem_kernel(%arg0: i32, %arg1: memref<1x256x147xbf16, #tpu.memory_space<vmem>>, %arg2: memref<147x64xbf16, #tpu.memory_space<vmem>>, %arg3: memref<1x64xf32, #tpu.memory_space<vmem>>, %arg4: memref<1x8x512xf32, #tpu.memory_space<vmem>>, %arg5: memref<18x16x64xf32, #tpu.memory_space<vmem>>, %arg6: memref<8x32x64xf32, #tpu.memory_space<vmem>>) attributes {dimension_semantics = [#tpu.dimension_semantics<parallel>], iteration_bounds = array<i64: 2>, scalar_prefetch = 0 : i64, scratch_operands = 2 : i64, tpu.core_type = #tpu.core_type<tc>, window_params = [{transform_indices = @transform_0, window_bounds = array<i64: 1, 256, 147>}, {pipeline_mode = #tpu.pipeline_mode<synchronous>, transform_indices = @transform_1, window_bounds = array<i64: 147, 64>}, {pipeline_mode = #tpu.pipeline_mode<synchronous>, transform_indices = @transform_2, window_bounds = array<i64: 1, 64>}, {transform_indices = @transform_3, window_bounds = array<i64: 1, 8, 512>}]} {
    %c0 = arith.constant 0 : index
    %c0_0 = arith.constant 0 : index
    %c0_1 = arith.constant 0 : index
    %0 = vector.load %arg1[%c0, %c0_0, %c0_1] : memref<1x256x147xbf16, #tpu.memory_space<vmem>>, vector<1x256x147xbf16>
    %1 = vector.shape_cast %0 : vector<1x256x147xbf16> to vector<256x147xbf16>
    %c0_2 = arith.constant 0 : index
    %c0_3 = arith.constant 0 : index
    %2 = vector.load %arg2[%c0_2, %c0_3] : memref<147x64xbf16, #tpu.memory_space<vmem>>, vector<147x64xbf16>
    %cst = arith.constant dense<0.000000e+00> : vector<256x64xf32>
    %3 = tpu.matmul %1, %2, %cst {dimension_numbers = #tpu.dot_dimension_numbers<[1], [0], [0], [1], [0, 0, 1, 1], [], []>} : vector<256x147xbf16>, vector<147x64xbf16>, vector<256x64xf32> -> vector<256x64xf32>
    %c0_4 = arith.constant 0 : index
    %c0_5 = arith.constant 0 : index
    %4 = vector.load %arg3[%c0_4, %c0_5] : memref<1x64xf32, #tpu.memory_space<vmem>>, vector<1x64xf32>
    %5 = vector.broadcast %4 : vector<1x64xf32> to vector<256x64xf32>
    %6 = arith.addf %3, %5 : vector<256x64xf32>
    %cst_6 = arith.constant 0.000000e+00 : f32
    %7 = vector.broadcast %cst_6 : f32 to vector<256x64xf32>
    %8 = arith.maximumf %6, %7 : vector<256x64xf32>
    %cst_7 = arith.constant 0.000000e+00 : f32
    %9 = vector.broadcast %cst_7 : f32 to vector<16x64xf32>
    %c0_8 = arith.constant 0 : index
    %c0_9 = arith.constant 0 : index
    %c0_10 = arith.constant 0 : index
    %10 = vector.load %arg5[%c0_8, %c0_9, %c0_10] : memref<18x16x64xf32, #tpu.memory_space<vmem>>, vector<1x16x64xf32>
    %11 = vector.shape_cast %10 : vector<1x16x64xf32> to vector<16x64xf32>
    %12 = vector.shape_cast %9 : vector<16x64xf32> to vector<1x16x64xf32>
    tpu.vector_store %arg5[%c0_8, %c0_9, %c0_10], %12 {strides = array<i32>} : memref<18x16x64xf32, #tpu.memory_space<vmem>>, vector<1x16x64xf32>,
    %cst_11 = arith.constant 0.000000e+00 : f32
    %13 = vector.broadcast %cst_11 : f32 to vector<16x64xf32>
    %c17 = arith.constant 17 : index
    %c0_12 = arith.constant 0 : index
    %c0_13 = arith.constant 0 : index
    %14 = vector.load %arg5[%c17, %c0_12, %c0_13] : memref<18x16x64xf32, #tpu.memory_space<vmem>>, vector<1x16x64xf32>
    %15 = vector.shape_cast %14 : vector<1x16x64xf32> to vector<16x64xf32>
    %16 = vector.shape_cast %13 : vector<16x64xf32> to vector<1x16x64xf32>
    tpu.vector_store %arg5[%c17, %c0_12, %c0_13], %16 {strides = array<i32>} : memref<18x16x64xf32, #tpu.memory_space<vmem>>, vector<1x16x64xf32>,
    %17 = vector.shape_cast %8 : vector<256x64xf32> to vector<16x16x64xf32>
    %c1 = arith.constant 1 : index
    %c0_14 = arith.constant 0 : index
    %c0_15 = arith.constant 0 : index
    %18 = vector.load %arg5[%c1, %c0_14, %c0_15] : memref<18x16x64xf32, #tpu.memory_space<vmem>>, vector<16x16x64xf32>
    tpu.vector_store %arg5[%c1, %c0_14, %c0_15], %17 {strides = array<i32>} : memref<18x16x64xf32, #tpu.memory_space<vmem>>, vector<16x16x64xf32>,
    %c0_16 = arith.constant 0 : index
    %c0_17 = arith.constant 0 : index
    %c0_18 = arith.constant 0 : index
    %19 = tpu.strided_load %arg5[%c0_16, %c0_17, %c0_18] {strides = array<i32: 2, 1, 1>} : memref<18x16x64xf32, #tpu.memory_space<vmem>>, vector<8x16x64xf32>
    %c1_19 = arith.constant 1 : index
    %c0_20 = arith.constant 0 : index
    %c0_21 = arith.constant 0 : index
    %20 = tpu.strided_load %arg5[%c1_19, %c0_20, %c0_21] {strides = array<i32: 2, 1, 1>} : memref<18x16x64xf32, #tpu.memory_space<vmem>>, vector<8x16x64xf32>
    %21 = arith.maximumf %19, %20 : vector<8x16x64xf32>
    %c2 = arith.constant 2 : index
    %c0_22 = arith.constant 0 : index
    %c0_23 = arith.constant 0 : index
    %22 = tpu.strided_load %arg5[%c2, %c0_22, %c0_23] {strides = array<i32: 2, 1, 1>} : memref<18x16x64xf32, #tpu.memory_space<vmem>>, vector<8x16x64xf32>
    %23 = arith.maximumf %21, %22 : vector<8x16x64xf32>
    %cst_24 = arith.constant 0.000000e+00 : f32
    %24 = vector.broadcast %cst_24 : f32 to vector<8x8x64xf32>
    %c0_25 = arith.constant 0 : index
    %c0_26 = arith.constant 0 : index
    %c0_27 = arith.constant 0 : index
    %25 = vector.load %arg6[%c0_25, %c0_26, %c0_27] : memref<8x32x64xf32, #tpu.memory_space<vmem>>, vector<8x8x64xf32>
    tpu.vector_store %arg6[%c0_25, %c0_26, %c0_27], %24 {strides = array<i32>} : memref<8x32x64xf32, #tpu.memory_space<vmem>>, vector<8x8x64xf32>,
    %cst_28 = arith.constant 0.000000e+00 : f32
    %26 = vector.broadcast %cst_28 : f32 to vector<8x8x64xf32>
    %c0_29 = arith.constant 0 : index
    %c24 = arith.constant 24 : index
    %c0_30 = arith.constant 0 : index
    %27 = vector.load %arg6[%c0_29, %c24, %c0_30] : memref<8x32x64xf32, #tpu.memory_space<vmem>>, vector<8x8x64xf32>
    tpu.vector_store %arg6[%c0_29, %c24, %c0_30], %26 {strides = array<i32>} : memref<8x32x64xf32, #tpu.memory_space<vmem>>, vector<8x8x64xf32>,
    %c0_31 = arith.constant 0 : index
    %c8 = arith.constant 8 : index
    %c0_32 = arith.constant 0 : index
    %28 = vector.load %arg6[%c0_31, %c8, %c0_32] : memref<8x32x64xf32, #tpu.memory_space<vmem>>, vector<8x16x64xf32>
    tpu.vector_store %arg6[%c0_31, %c8, %c0_32], %23 {strides = array<i32>} : memref<8x32x64xf32, #tpu.memory_space<vmem>>, vector<8x16x64xf32>,
    %c0_33 = arith.constant 0 : index
    %c7 = arith.constant 7 : index
    %c0_34 = arith.constant 0 : index
    %29 = tpu.strided_load %arg6[%c0_33, %c7, %c0_34] {strides = array<i32: 1, 2, 1>} : memref<8x32x64xf32, #tpu.memory_space<vmem>>, vector<8x8x64xf32>
    %c0_35 = arith.constant 0 : index
    %c8_36 = arith.constant 8 : index
    %c0_37 = arith.constant 0 : index
    %30 = tpu.strided_load %arg6[%c0_35, %c8_36, %c0_37] {strides = array<i32: 1, 2, 1>} : memref<8x32x64xf32, #tpu.memory_space<vmem>>, vector<8x8x64xf32>
    %31 = arith.maximumf %29, %30 : vector<8x8x64xf32>
    %c0_38 = arith.constant 0 : index
    %c9 = arith.constant 9 : index
    %c0_39 = arith.constant 0 : index
    %32 = tpu.strided_load %arg6[%c0_38, %c9, %c0_39] {strides = array<i32: 1, 2, 1>} : memref<8x32x64xf32, #tpu.memory_space<vmem>>, vector<8x8x64xf32>
    %33 = arith.maximumf %31, %32 : vector<8x8x64xf32>
    %34 = vector.shape_cast %33 : vector<8x8x64xf32> to vector<8x512xf32>
    %c0_40 = arith.constant 0 : index
    %c0_41 = arith.constant 0 : index
    %c0_42 = arith.constant 0 : index
    %35 = vector.load %arg4[%c0_40, %c0_41, %c0_42] : memref<1x8x512xf32, #tpu.memory_space<vmem>>, vector<1x8x512xf32>
    %36 = vector.shape_cast %35 : vector<1x8x512xf32> to vector<8x512xf32>
    %37 = vector.shape_cast %34 : vector<8x512xf32> to vector<1x8x512xf32>
    tpu.vector_store %arg4[%c0_40, %c0_41, %c0_42], %37 {strides = array<i32>} : memref<1x8x512xf32, #tpu.memory_space<vmem>>, vector<1x8x512xf32>,
    return
  }
  func.func @transform_0(%arg0: i32) -> (i32, i32, i32) {
    %c0_i32 = arith.constant 0 : i32
    %c0_i32_0 = arith.constant 0 : i32
    %c0_i32_1 = arith.constant 0 : i32
    return %arg0, %c0_i32, %c0_i32_0 : i32, i32, i32
  }
  func.func @transform_1(%arg0: i32) -> (i32, i32) {
    %c0_i32 = arith.constant 0 : i32
    %c0_i32_0 = arith.constant 0 : i32
    %c0_i32_1 = arith.constant 0 : i32
    return %c0_i32, %c0_i32_0 : i32, i32
  }
  func.func @transform_2(%arg0: i32) -> (i32, i32) {
    %c0_i32 = arith.constant 0 : i32
    %c0_i32_0 = arith.constant 0 : i32
    %c0_i32_1 = arith.constant 0 : i32
    return %c0_i32, %c0_i32_0 : i32, i32
  }
  func.func @transform_3(%arg0: i32) -> (i32, i32, i32) {
    %c0_i32 = arith.constant 0 : i32
    %c0_i32_0 = arith.constant 0 : i32
    %c0_i32_1 = arith.constant 0 : i32
    return %arg0, %c0_i32, %c0_i32_0 : i32, i32, i32
  }
}

</mosaic_0001>

<bundles_post_ra>
// kernel: net_exit2_part1l.1
= control target key start
LH: loop header
LB: loop body
LE: loop exit
PB: predicated region body
PF: predicated region fallthrough
CT: control target
= control target key end

     0   :  { %s1393_s12 = smov 0   ;;  %s1699_s0 = inlined_call_operand.vmem [shape: bf16[2,256,147], index: 0, kind: input, shape index: {}]   ;;  %s1700_s1 = inlined_call_operand.vmem [shape: bf16[147,64], index: 1, kind: input, shape index: {}]   ;;  %s1701_s2 = inlined_call_operand.vmem [shape: f32[1,64], index: 2, kind: input, shape index: {}]   ;;  %s1702_s3 = inlined_call_operand.vmem [shape: f32[2,8,512], index: 3, kind: output, shape index: {}]  }
   0x1 LB: > { %s1102_s13 = sadd.s32 4294967295, %s1366_s12   ;;  %p1106_p0 = scmp.ge.s32.totalorder %s1366_s12, 1  ;;  %s1366_s12 = sphi %s1393_s12, %s13_s12  }
   0x2   : > { %p137_p1 = scmp.lt.s32.totalorder %s1366_s12, 3 }
   0x4   : > { %p138_p2 = pnand %p1106_p0, %p137_p1 }
   0x5   : > { %p161_p3 = scmp.lt.s32.totalorder (!%p138_p2), %s1102_s13, 1  ;;  %s1372_s15 = smov (!%p138_p2), 64  }
   0x6   : > { %141 = sbr.rel (%p138_p2) target bundleno = 459 (0x1cb), region = 32 }
   0xb   : > { %v1334_v0 = vld [vmem:[%s1700_s1 + $0x38] sm:$0xff]  ;;  %v222_v1 = vld [vmem:[%s1700_s1 + $0x48] sm:$0x3]  ;;  %vm477_vm0 = vcmask 1040384   ;;  %vm478_vm1 = vcmask 1041408   ;;  %v1333_v3 = vld [vmem:[%s1700_s1 + $0x30] sm:$0xff] }
   0xc   : > { %v408_v2 = vunpack.c.l.b16 %v222_v1  ;;  %484 = vmatpush.bf16.msra.mxu0 %v1334_v0  ;;  %1336 = vmatpush.bf16.msra.mxu2 %v1334_v0  ;;  %v1368_v4 = vmov 65535   ;;  %s1704_s13 = smov (!%p161_p3, %s1102_s13), 1  ;;  %v1332_v9 = vld [vmem:[%s1700_s1 + $0x28] sm:$0xff]  ;;  %v1335_v10 = vld [vmem:[%s1700_s1 + $0x40] sm:$0xff]  ;;  %vm428_vm2 = vcmask 154624   ;;  %v1330_v18 = vld [vmem:[%s1700_s1 + $0x18] sm:$0xff] }
   0xd   : > { %v479_v5 = vsel %vm477_vm0, 4294967295, %v1368_v4  ;;  %s1293_s20 = sshll.u32 %s1704_s13, 8  ;;  %v1331_v15 = vld [vmem:[%s1700_s1 + $0x20] sm:$0xff]  ;;  %v1329_v19 = vld [vmem:[%s1700_s1 + $0x10] sm:$0xff]  ;;  %v1328_v20 = vld [vmem:[%s1700_s1 + $0x8] sm:$0xff]  ;;  %vm694_vm3 = vcmask 523264  }
   0xe   : > { %v418_v6 = vpack.c.b16 %v408_v2, %v408_v2  ;;  %v480_v7 = vsel %vm478_vm1, %v479_v5, 0  ;;  %s1419_s25 = scalar_lea.vmem %s1699_s0, %s1293_s20  ;;  %v1327_v26 = vld [vmem:[%s1700_s1] sm:$0xff]  ;;  %vm911_vm4 = vcmask 1047556   ;;  %s1294_s16 = sshll.u32 %s1704_s13, 5 }
   0xf   : > { %v1295_v11 = vld [vmem:[%s1419_s25 + $0x4] sm:$0xf]  ;;  %v1115_v12 = vld [vmem:[%s1419_s25 + $0x8] sm:$0xf0]  ;;  %v1313_v13 = vld [vmem:[%s1419_s25 + $0x94] sm:$0xf]  ;;  %s170_s19 = scalar_lea.vmem %s1702_s3, %s1294_s16 }
  0x10   : > { %v482_v8 = vand.u32 %v480_v7, %v418_v6  ;;  %485 = vmatpush.bf16.msra.mxu0 %v1333_v3  ;;  %1337 = vmatpush.bf16.msra.mxu2 %v1333_v3  ;;  %v1118_v14 = vor.u32 %v1295_v11, %v1115_v12  ;;  %v1187_v16 = vld [vmem:[%s1419_s25 + $0x98] sm:$0xf0]  ;;  %v1297_v21 = vld [vmem:[%s1419_s25 + $0x14] sm:$0xf]  ;;  %v1315_v23 = vld [vmem:[%s1419_s25 + $0xa4] sm:$0xf] }
  0x11   : > { %v1190_v17 = vor.u32 %v1313_v13, %v1187_v16  ;;  %v1123_v22 = vld [vmem:[%s1419_s25 + $0x18] sm:$0xf0]  ;;  %v1195_v24 = vld [vmem:[%s1419_s25 + $0xa8] sm:$0xf0]  ;;  %v1113_v27 = vld [vmem:[%s1419_s25] sm:$0xf] }
  0x12   : > { %579 = vmatpush.bf16.msra.mxu1 %v482_v8  ;;  %1344 = vmatpush.bf16.msra.mxu3 %v482_v8  ;;  %v1126_v25 = vor.u32 %v1297_v21, %v1123_v22  ;;  %v1296_v28 = vld [vmem:[%s1419_s25 + $0x4] sm:$0xf0]  ;;  %v1177_v29 = vld [vmem:[%s1419_s25 + $0x80] sm:$0xf]  ;;  %v1198_v31 = vor.u32 %v1315_v23, %v1195_v24  ;;  %v1299_v34 = vld [vmem:[%s1419_s25 + $0x24] sm:$0xf] }
  0x13   : > { %v1312_v30 = vld [vmem:[%s1419_s25 + $0x84] sm:$0xf0]  ;;  %v1114_v32 = vor.u32 %v1296_v28, %v1113_v27  ;;  %v1131_v35 = vld [vmem:[%s1419_s25 + $0x28] sm:$0xf0]  ;;  %v1317_v36 = vld [vmem:[%s1419_s25 + $0xb4] sm:$0xf] }
  0x14   : > { %486 = vmatpush.bf16.msra.mxu0 %v1332_v9  ;;  %1338 = vmatpush.bf16.msra.mxu2 %v1332_v9  ;;  %v1178_v33 = vor.u32 %v1312_v30, %v1177_v29  ;;  %v1203_v37 = vld [vmem:[%s1419_s25 + $0xb8] sm:$0xf0]  ;;  %v1134_v38 = vor.u32 %v1299_v34, %v1131_v35  ;;  %v1121_v39 = vld [vmem:[%s1419_s25 + $0x10] sm:$0xf]  ;;  %v1298_v40 = vld [vmem:[%s1419_s25 + $0x14] sm:$0xf0] }
  0x15   : > { %v1185_v41 = vld [vmem:[%s1419_s25 + $0x90] sm:$0xf]  ;;  %v1314_v42 = vld [vmem:[%s1419_s25 + $0x94] sm:$0xf0]  ;;  %v1206_v43 = vor.u32 %v1317_v36, %v1203_v37  ;;  %v1122_v44 = vor.u32 %v1298_v40, %v1121_v39  ;;  %v1301_v46 = vld [vmem:[%s1419_s25 + $0x34] sm:$0xf] }
  0x16   : > { %580 = vmatpush.bf16.msra.mxu1 %v1335_v10  ;;  %1345 = vmatpush.bf16.msra.mxu3 %v1335_v10  ;;  %v1186_v45 = vor.u32 %v1314_v42, %v1185_v41  ;;  %v1139_v47 = vld [vmem:[%s1419_s25 + $0x38] sm:$0xf0]  ;;  %v1319_v48 = vld [vmem:[%s1419_s25 + $0xc4] sm:$0xf]  ;;  %v1211_v49 = vld [vmem:[%s1419_s25 + $0xc8] sm:$0xf0] }
  0x17   : > { %v1142_v50 = vor.u32 %v1301_v46, %v1139_v47  ;;  %v1129_v51 = vld [vmem:[%s1419_s25 + $0x20] sm:$0xf]  ;;  %v1300_v52 = vld [vmem:[%s1419_s25 + $0x24] sm:$0xf0]  ;;  %v1214_v55 = vor.u32 %v1319_v48, %v1211_v49  ;;  %v1303_v58 = vld [vmem:[%s1419_s25 + $0x44] sm:$0xf] }
  0x18   : > { %487 = vmatpush.bf16.msra.mxu0 %v1331_v15  ;;  %1339 = vmatpush.bf16.msra.mxu2 %v1331_v15  ;;  %v1193_v53 = vld [vmem:[%s1419_s25 + $0xa0] sm:$0xf]  ;;  %v1316_v54 = vld [vmem:[%s1419_s25 + $0xa4] sm:$0xf0]  ;;  %v1130_v56 = vor.u32 %v1300_v52, %v1129_v51  ;;  %v1147_v59 = vld [vmem:[%s1419_s25 + $0x48] sm:$0xf0] }
  0x19   : > { %1275 = vmatmul.msk.bf16.vlgmr.msra.gmra.mxu1 %vm428_vm2, %v1118_v14  ;;  %1284 = vmatmul.msk.bf16.vlgmr.msra.gmra.mxu3 %vm428_vm2, %v1190_v17  ;;  %v1194_v57 = vor.u32 %v1316_v54, %v1193_v53  ;;  %v1321_v60 = vld [vmem:[%s1419_s25 + $0xd4] sm:$0xf]  ;;  %v1219_v61 = vld [vmem:[%s1419_s25 + $0xd8] sm:$0xf0]  ;;  %v1150_v62 = vor.u32 %v1303_v58, %v1147_v59  ;;  %v1137_v63 = vld [vmem:[%s1419_s25 + $0x30] sm:$0xf] }
  0x1a   : > { %v1302_v0 = vld [vmem:[%s1419_s25 + $0x34] sm:$0xf0]  ;;  %v1201_v1 = vld [vmem:[%s1419_s25 + $0xb0] sm:$0xf]  ;;  %v1222_v3 = vor.u32 %v1321_v60, %v1219_v61  ;;  %v1305_v6 = vld [vmem:[%s1419_s25 + $0x54] sm:$0xf] }
  0x1b   : > { %v1318_v2 = vld [vmem:[%s1419_s25 + $0xb4] sm:$0xf0]  ;;  %v1138_v4 = vor.u32 %v1302_v0, %v1137_v63  ;;  %v1155_v7 = vld [vmem:[%s1419_s25 + $0x58] sm:$0xf0]  ;;  %v1323_v8 = vld [vmem:[%s1419_s25 + $0xe4] sm:$0xf] }
  0x1c   : > { %488 = vmatpush.bf16.msra.mxu0 %v1330_v18  ;;  %1340 = vmatpush.bf16.msra.mxu2 %v1330_v18  ;;  %v1202_v5 = vor.u32 %v1318_v2, %v1201_v1  ;;  %v1227_v9 = vld [vmem:[%s1419_s25 + $0xe8] sm:$0xf0]  ;;  %v1158_v10 = vor.u32 %v1305_v6, %v1155_v7  ;;  %v1145_v11 = vld [vmem:[%s1419_s25 + $0x40] sm:$0xf]  ;;  %v1304_v12 = vld [vmem:[%s1419_s25 + $0x44] sm:$0xf0] }
  0x1d   : > { %v1209_v13 = vld [vmem:[%s1419_s25 + $0xc0] sm:$0xf]  ;;  %v1320_v14 = vld [vmem:[%s1419_s25 + $0xc4] sm:$0xf0]  ;;  %v1230_v15 = vor.u32 %v1323_v8, %v1227_v9  ;;  %v1146_v16 = vor.u32 %v1304_v12, %v1145_v11  ;;  %v1307_v18 = vld [vmem:[%s1419_s25 + $0x64] sm:$0xf] }
  0x1e   : > { %v1210_v17 = vor.u32 %v1320_v14, %v1209_v13  ;;  %v1235_v21 = vld [vmem:[%s1419_s25 + $0xf8] sm:$0xf0]  ;;  %v1153_v23 = vld [vmem:[%s1419_s25 + $0x50] sm:$0xf]  ;;  %v1306_v24 = vld [vmem:[%s1419_s25 + $0x54] sm:$0xf0] }
  0x1f   : > { %v1154_v28 = vor.u32 %v1306_v24, %v1153_v23  ;;  %v1309_v30 = vld [vmem:[%s1419_s25 + $0x74] sm:$0xf]  ;;  %v1308_v34 = vld [vmem:[%s1419_s25 + $0x64] sm:$0xf0]  ;;  %v1225_v35 = vld [vmem:[%s1419_s25 + $0xe0] sm:$0xf] }
  0x20   : > { %489 = vmatpush.bf16.msra.mxu0 %v1329_v19  ;;  %1341 = vmatpush.bf16.msra.mxu2 %v1329_v19  ;;  %v1163_v19 = vld [vmem:[%s1419_s25 + $0x68] sm:$0xf0]  ;;  %v1324_v36 = vld [vmem:[%s1419_s25 + $0xe4] sm:$0xf0]  ;;  %v1369_v39 = vmov 0.0  }
  0x21   : > { %v1166_v22 = vor.u32 %v1307_v18, %v1163_v19  ;;  %695 = vst.msk [vmem:[#allocation2] sm:$0xff] %vm694_vm3, %v1369_v39  ;;  %v1311_v40 = vld [vmem:[%s1419_s25 + $0x84] sm:$0xf]  ;;  %v1179_v41 = vld [vmem:[%s1419_s25 + $0x88] sm:$0xf0] }
  0x22   : > { %v1182_v42 = vor.u32 %v1311_v40, %v1179_v41  ;;  %v1233_v46 = vld [vmem:[%s1419_s25 + $0xf0] sm:$0xf]  ;;  %v1326_v47 = vld [vmem:[%s1419_s25 + $0xf4] sm:$0xf0]  ;;  %696 = vst.msk [vmem:[#allocation2 + $0x8] sm:$0xff] %vm694_vm3, %v1369_v39 }
  0x23   : > { %v1234_v49 = vor.u32 %v1326_v47, %v1233_v46  ;;  %814 = vst.msk [vmem:[#allocation3] sm:$0xff] %vm694_vm3, %v1369_v39  ;;  %v1532_v52 = vld [vmem:[%s1701_s2] ss:$0 sm:$0xff] }
  0x24   : > { %490 = vmatpush.bf16.msra.mxu0 %v1328_v20  ;;  %1342 = vmatpush.bf16.msra.mxu2 %v1328_v20  ;;  %v1325_v20 = vld [vmem:[%s1419_s25 + $0xf4] sm:$0xf]  ;;  %815 = vst.msk [vmem:[#allocation3 + $0x20] sm:$0xff] %vm694_vm3, %v1369_v39 }
  0x25   : > { %v1238_v27 = vor.u32 %v1325_v20, %v1235_v21  ;;  %816 = vst.msk [vmem:[#allocation3 + $0x40] sm:$0xff] %vm694_vm3, %v1369_v39 }
  0x26   : > { %817 = vst.msk [vmem:[#allocation3 + $0x60] sm:$0xff] %vm694_vm3, %v1369_v39 }
  0x27   : > { %818 = vst.msk [vmem:[#allocation3 + $0x80] sm:$0xff] %vm694_vm3, %v1369_v39 }
  0x28   : > { %491 = vmatpush.bf16.msra.mxu0 %v1327_v26  ;;  %1343 = vmatpush.bf16.msra.mxu2 %v1327_v26  ;;  %v1322_v26 = vld [vmem:[%s1419_s25 + $0xd4] sm:$0xf0]  ;;  %819 = vst.msk [vmem:[#allocation3 + $0xa0] sm:$0xff] %vm694_vm3, %v1369_v39  ;;  %v733_v13 = vld [vmem:[#allocation2] sm:$0xff] }
  0x29   : > { %1276 = vmatmul.msk.bf16.gmra.mxu1 %vm428_vm2, %v1126_v25  ;;  %1285 = vmatmul.msk.bf16.gmra.mxu3 %vm428_vm2, %v1198_v31  ;;  %v1217_v25 = vld [vmem:[%s1419_s25 + $0xd0] sm:$0xf]  ;;  %v1171_v31 = vld [vmem:[%s1419_s25 + $0x78] sm:$0xf0]  ;;  %820 = vst.msk [vmem:[#allocation3 + $0xc0] sm:$0xff] %vm694_vm3, %v1369_v39 }
  0x2a   : > { %v1218_v29 = vor.u32 %v1322_v26, %v1217_v25  ;;  %821 = vst.msk [vmem:[#allocation3 + $0xe0] sm:$0xff] %vm694_vm3, %v1369_v39 }
  0x2b   : > { %492 = vmatmul.bf16.vlgmr.msra.gmra.mxu0 %v1114_v32  ;;  %532 = vmatmul.bf16.vlgmr.msra.gmra.mxu2 %v1178_v33  ;;  %v1174_v32 = vor.u32 %v1309_v30, %v1171_v31  ;;  %v1161_v33 = vld [vmem:[%s1419_s25 + $0x60] sm:$0xf] }
  0x2c   : > { %v1162_v37 = vor.u32 %v1308_v34, %v1161_v33 }
  0x39   : > { %1277 = vmatmul.msk.bf16.gmra.mxu1 %vm428_vm2, %v1134_v38  ;;  %1286 = vmatmul.msk.bf16.gmra.mxu3 %vm428_vm2, %v1206_v43  ;;  %v1226_v38 = vor.u32 %v1324_v36, %v1225_v35  ;;  %v1169_v43 = vld [vmem:[%s1419_s25 + $0x70] sm:$0xf] }
  0x3b   : > { %497 = vmatmul.bf16.gmra.mxu0 %v1122_v44  ;;  %537 = vmatmul.bf16.gmra.mxu2 %v1186_v45  ;;  %v1310_v44 = vld [vmem:[%s1419_s25 + $0x74] sm:$0xf0] }
  0x3c   : > { %v1170_v48 = vor.u32 %v1310_v44, %v1169_v43 }
  0x49   : > { %1278 = vmatmul.msk.bf16.gmra.mxu1 %vm428_vm2, %v1142_v50  ;;  %1287 = vmatmul.msk.bf16.gmra.mxu3 %vm428_vm2, %v1214_v55 }
  0x4b   : > { %502 = vmatmul.bf16.gmra.mxu0 %v1130_v56  ;;  %542 = vmatmul.bf16.gmra.mxu2 %v1194_v57 }
  0x59   : > { %1279 = vmatmul.msk.bf16.gmra.mxu1 %vm428_vm2, %v1150_v62  ;;  %1288 = vmatmul.msk.bf16.gmra.mxu3 %vm428_vm2, %v1222_v3 }
  0x5b   : > { %507 = vmatmul.bf16.gmra.mxu0 %v1138_v4  ;;  %547 = vmatmul.bf16.gmra.mxu2 %v1202_v5 }
  0x69   : > { %1280 = vmatmul.msk.bf16.gmra.mxu1 %vm428_vm2, %v1158_v10  ;;  %1289 = vmatmul.msk.bf16.gmra.mxu3 %vm428_vm2, %v1230_v15 }
  0x6b   : > { %512 = vmatmul.bf16.gmra.mxu0 %v1146_v16  ;;  %552 = vmatmul.bf16.gmra.mxu2 %v1210_v17 }
  0x79   : > { %1281 = vmatmul.msk.bf16.gmra.mxu1 %vm428_vm2, %v1166_v22  ;;  %1290 = vmatmul.msk.bf16.gmra.mxu3 %vm428_vm2, %v1238_v27 }
  0x7b   : > { %517 = vmatmul.bf16.gmra.mxu0 %v1154_v28  ;;  %557 = vmatmul.bf16.gmra.mxu2 %v1218_v29  ;;  %v734_v28 = vld [vmem:[#allocation2 + $0x8] sm:$0xff] }
  0x89   : > { %1282 = vmatmul.msk.bf16.gmra.mxu1 %vm428_vm2, %v1174_v32 }
  0x8b   : > { %522 = vmatmul.bf16.gmra.mxu0 %v1162_v37  ;;  %562 = vmatmul.bf16.gmra.mxu2 %v1226_v38 }
  0x96   : > { %v582_v45 = vpop.f32.mrf.mxu1 }
  0x99   : > { %1283 = vmatmul.msk.bf16.gmra.mxu1 %vm428_vm2, %v1182_v42 }
  0x9b   : > { %527 = vmatmul.bf16.gmra.mxu0 %v1170_v48  ;;  %567 = vmatmul.bf16.gmra.mxu2 %v1234_v49 }
  0x9c   : > { %v627_v53 = vpop.f32.mrf.mxu3 }
  0x9e   : > { %v584_v50 = vpop.f32.mrf.mxu1 }
  0xa4   : > { %v629_v62 = vpop.f32.mrf.mxu3 }
  0xa6   : > { %v587_v51 = vpop.f32.mrf.mxu1 }
  0xa8   : > { %v493_v54 = vpop.f32.mrf.mxu0 }
  0xa9   : > { %v494_v55 = vadd.f32 %v1532_v52, %v493_v54 }
  0xab   : > { %v583_v56 = vadd.f32 %v582_v45, %v494_v55 }
  0xac   : > { %v632_v6 = vpop.f32.mrf.mxu3 }
  0xad   : > { %v662_v57 = vmax.f32 %v583_v56, 0.0 }
  0xae   : > { %v589_v58 = vpop.f32.mrf.mxu1  ;;  %v1536_v59 = vpop.f32.mrf.mxu2 }
  0xaf   : > { %701 = vst.msk [vmem:[#allocation2 + $0x10] sm:$0xff] %vm694_vm3, %v662_v57 }
  0xb0   : > { %v495_v60 = vpop.f32.mrf.mxu0 }
  0xb1   : > { %v496_v61 = vadd.f32 %v1532_v52, %v495_v60 }
  0xb3   : > { %v585_v63 = vadd.f32 %v584_v50, %v496_v61 }
  0xb4   : > { %v634_v21 = vpop.f32.mrf.mxu3 }
  0xb5   : > { %v663_v0 = vmax.f32 %v585_v63, 0.0 }
  0xb6   : > { %v592_v1 = vpop.f32.mrf.mxu1  ;;  %v1540_v2 = vpop.f32.mrf.mxu2  ;;  %v749_v14 = vld [vmem:[#allocation2 + $0x10] sm:$0xff] }
  0xb7   : > { %702 = vst.msk [vmem:[#allocation2 + $0x18] sm:$0xff] %vm694_vm3, %v663_v0  ;;  %v765_v18 = vmax.f32 %v733_v13, %v749_v14 }
  0xb8   : > { %v498_v3 = vpop.f32.mrf.mxu0 }
  0xb9   : > { %v499_v4 = vadd.f32 %v1532_v52, %v498_v3 }
  0xbb   : > { %v588_v5 = vadd.f32 %v587_v51, %v499_v4 }
  0xbc   : > { %v637_v39 = vpop.f32.mrf.mxu3 }
  0xbd   : > { %v664_v7 = vmax.f32 %v588_v5, 0.0 }
  0xbe   : > { %v594_v8 = vpop.f32.mrf.mxu1  ;;  %v538_v9 = vpop.f32.mrf.mxu2  ;;  %v750_v29 = vld [vmem:[#allocation2 + $0x18] sm:$0xff] }
  0xbf   : > { %703 = vst.msk [vmem:[#allocation2 + $0x20] sm:$0xff] %vm694_vm3, %v664_v7  ;;  %v539_v10 = vadd.f32 %v1532_v52, %v538_v9  ;;  %v766_v33 = vmax.f32 %v734_v28, %v750_v29 }
  0xc0   : > { %v500_v11 = vpop.f32.mrf.mxu0 }
  0xc1   : > { %v501_v12 = vadd.f32 %v1532_v52, %v500_v11  ;;  %v628_v15 = vadd.f32 %v627_v53, %v539_v10 }
  0xc3   : > { %v590_v16 = vadd.f32 %v589_v58, %v501_v12  ;;  %v680_v17 = vmax.f32 %v628_v15, 0.0 }
  0xc4   : > { %v639_v53 = vpop.f32.mrf.mxu3 }
  0xc5   : > { %v665_v19 = vmax.f32 %v590_v16, 0.0  ;;  %719 = vst.msk [vmem:[#allocation2 + $0xa0] sm:$0xff] %vm694_vm3, %v680_v17 }
  0xc6   : > { %v597_v20 = vpop.f32.mrf.mxu1  ;;  %v735_v22 = vld [vmem:[#allocation2 + $0x20] sm:$0xff]  ;;  %v540_v24 = vpop.f32.mrf.mxu2 }
  0xc7   : > { %v798_v23 = vmax.f32 %v765_v18, %v735_v22  ;;  %704 = vst.msk [vmem:[#allocation2 + $0x28] sm:$0xff] %vm694_vm3, %v665_v19  ;;  %v541_v25 = vadd.f32 %v1532_v52, %v540_v24 }
  0xc8   : > { %v503_v26 = vpop.f32.mrf.mxu0 }
  0xc9   : > { %830 = vst.msk [vmem:[#allocation3 + $0x8] sm:$0xff] %vm694_vm3, %v798_v23  ;;  %v504_v27 = vadd.f32 %v1532_v52, %v503_v26  ;;  %v630_v30 = vadd.f32 %v629_v62, %v541_v25 }
  0xcb   : > { %v593_v31 = vadd.f32 %v592_v1, %v504_v27  ;;  %v681_v32 = vmax.f32 %v630_v30, 0.0 }
  0xcc   : > { %v642_v4 = vpop.f32.mrf.mxu3  ;;  %v1575_v18 = vld [vmem:[#allocation2 + $0xa0] sm:$0xff] }
  0xcd   : > { %v666_v34 = vmax.f32 %v593_v31, 0.0  ;;  %720 = vst.msk [vmem:[#allocation2 + $0xa8] sm:$0xff] %vm694_vm3, %v681_v32 }
  0xce   : > { %v599_v35 = vpop.f32.mrf.mxu1  ;;  %v1551_v36 = vld [vmem:[#allocation2 + $0x28] sm:$0xff]  ;;  %v543_v38 = vpop.f32.mrf.mxu2 }
  0xcf   : > { %v799_v37 = vmax.f32 %v766_v33, %v1551_v36  ;;  %705 = vst.msk [vmem:[#allocation2 + $0x30] sm:$0xff] %vm694_vm3, %v666_v34  ;;  %v544_v40 = vadd.f32 %v1532_v52, %v543_v38 }
  0xd0   : > { %v505_v41 = vpop.f32.mrf.mxu0 }
  0xd1   : > { %831 = vst.msk [vmem:[#allocation3 + $0x10] sm:$0xff] %vm694_vm3, %v799_v37  ;;  %v506_v42 = vadd.f32 %v1532_v52, %v505_v41  ;;  %v633_v43 = vadd.f32 %v632_v6, %v544_v40 }
  0xd3   : > { %v595_v44 = vadd.f32 %v594_v8, %v506_v42  ;;  %v682_v45 = vmax.f32 %v633_v43, 0.0 }
  0xd4   : > { %v644_v26 = vpop.f32.mrf.mxu3 }
  0xd5   : > { %v667_v46 = vmax.f32 %v595_v44, 0.0  ;;  %721 = vst.msk [vmem:[#allocation2 + $0xb0] sm:$0xff] %vm694_vm3, %v682_v45 }
  0xd6   : > { %v602_v47 = vpop.f32.mrf.mxu1  ;;  %v545_v48 = vpop.f32.mrf.mxu2  ;;  %v751_v0 = vld [vmem:[#allocation2 + $0x30] sm:$0xff] }
  0xd7   : > { %706 = vst.msk [vmem:[#allocation2 + $0x38] sm:$0xff] %vm694_vm3, %v667_v46  ;;  %v546_v49 = vadd.f32 %v1532_v52, %v545_v48  ;;  %v767_v6 = vmax.f32 %v735_v22, %v751_v0 }
  0xd8   : > { %v508_v50 = vpop.f32.mrf.mxu0 }
  0xd9   : > { %v509_v51 = vadd.f32 %v1532_v52, %v508_v50  ;;  %v635_v54 = vadd.f32 %v634_v21, %v546_v49 }
  0xdb   : > { %v598_v55 = vadd.f32 %v597_v20, %v509_v51  ;;  %v683_v56 = vmax.f32 %v635_v54, 0.0 }
  0xdc   : > { %v759_v14 = vld [vmem:[#allocation2 + $0xb0] sm:$0xff]  ;;  %v647_v45 = vpop.f32.mrf.mxu3 }
  0xdd   : > { %v668_v57 = vmax.f32 %v598_v55, 0.0  ;;  %722 = vst.msk [vmem:[#allocation2 + $0xb8] sm:$0xff] %vm694_vm3, %v683_v56  ;;  %v775_v20 = vmax.f32 %v1575_v18, %v759_v14 }
  0xde   : > { %v604_v58 = vpop.f32.mrf.mxu1  ;;  %v548_v60 = vpop.f32.mrf.mxu2  ;;  %v752_v16 = vld [vmem:[#allocation2 + $0x38] sm:$0xff] }
  0xdf   : > { %707 = vst.msk [vmem:[#allocation2 + $0x40] sm:$0xff] %vm694_vm3, %v668_v57  ;;  %v549_v61 = vadd.f32 %v1532_v52, %v548_v60  ;;  %v768_v22 = vmax.f32 %v1551_v36, %v752_v16  ;;  %v1591_v36 = vld [vmem:[#allocation2 + $0xa8] sm:$0xff] }
  0xe0   : > { %v510_v62 = vpop.f32.mrf.mxu0 }
  0xe1   : > { %v511_v63 = vadd.f32 %v1532_v52, %v510_v62  ;;  %v638_v1 = vadd.f32 %v637_v39, %v549_v61 }
  0xe3   : > { %v600_v3 = vadd.f32 %v599_v35, %v511_v63  ;;  %v684_v5 = vmax.f32 %v638_v1, 0.0 }
  0xe4   : > { %v760_v33 = vld [vmem:[#allocation2 + $0xb8] sm:$0xff]  ;;  %v649_v60 = vpop.f32.mrf.mxu3 }
  0xe5   : > { %v669_v7 = vmax.f32 %v600_v3, 0.0  ;;  %723 = vst.msk [vmem:[#allocation2 + $0xc0] sm:$0xff] %vm694_vm3, %v684_v5  ;;  %v776_v38 = vmax.f32 %v1591_v36, %v760_v33  ;;  %v534_v33 = vadd.f32 %v1532_v52, %v1536_v59 }
  0xe6   : > { %v607_v8 = vpop.f32.mrf.mxu1  ;;  %v1567_v9 = vld [vmem:[#allocation2 + $0x40] sm:$0xff]  ;;  %v550_v11 = vpop.f32.mrf.mxu2 }
  0xe7   : > { %v800_v10 = vmax.f32 %v767_v6, %v1567_v9  ;;  %708 = vst.msk [vmem:[#allocation2 + $0x48] sm:$0xff] %vm694_vm3, %v669_v7  ;;  %v551_v12 = vadd.f32 %v1532_v52, %v550_v11 }
  0xe8   : > { %v513_v13 = vpop.f32.mrf.mxu0 }
  0xe9   : > { %832 = vst.msk [vmem:[#allocation3 + $0x28] sm:$0xff] %vm694_vm3, %v800_v10  ;;  %v514_v15 = vadd.f32 %v1532_v52, %v513_v13  ;;  %v640_v17 = vadd.f32 %v639_v53, %v551_v12 }
  0xeb   : > { %v603_v19 = vadd.f32 %v602_v47, %v514_v15  ;;  %v685_v21 = vmax.f32 %v640_v17, 0.0 }
  0xec   : > { %v1579_v23 = vld [vmem:[#allocation2 + $0xc0] sm:$0xff]  ;;  %v652_v15 = vpop.f32.mrf.mxu3 }
  0xed   : > { %v670_v24 = vmax.f32 %v603_v19, 0.0  ;;  %v808_v27 = vmax.f32 %v775_v20, %v1579_v23  ;;  %724 = vst.msk [vmem:[#allocation2 + $0xc8] sm:$0xff] %vm694_vm3, %v685_v21 }
  0xee   : > { %v609_v25 = vpop.f32.mrf.mxu1  ;;  %v1582_v28 = vld [vmem:[#allocation2 + $0x48] sm:$0xff]  ;;  %v553_v30 = vpop.f32.mrf.mxu2 }
  0xef   : > { %v801_v29 = vmax.f32 %v768_v22, %v1582_v28  ;;  %709 = vst.msk [vmem:[#allocation2 + $0x50] sm:$0xff] %vm694_vm3, %v670_v24  ;;  %v554_v31 = vadd.f32 %v1532_v52, %v553_v30 }
  0xf0   : > { %840 = vst.msk [vmem:[#allocation3 + $0xa8] sm:$0xff] %vm694_vm3, %v808_v27  ;;  %v515_v32 = vpop.f32.mrf.mxu0 }
  0xf1   : > { %833 = vst.msk [vmem:[#allocation3 + $0x30] sm:$0xff] %vm694_vm3, %v801_v29  ;;  %v516_v34 = vadd.f32 %v1532_v52, %v515_v32  ;;  %v643_v35 = vadd.f32 %v642_v4, %v554_v31 }
  0xf3   : > { %v605_v37 = vadd.f32 %v604_v58, %v516_v34  ;;  %v686_v39 = vmax.f32 %v643_v35, 0.0 }
  0xf4   : > { %v1594_v40 = vld [vmem:[#allocation2 + $0xc8] sm:$0xff] }
  0xf5   : > { %v671_v41 = vmax.f32 %v605_v37, 0.0  ;;  %v809_v43 = vmax.f32 %v776_v38, %v1594_v40  ;;  %725 = vst.msk [vmem:[#allocation2 + $0xd0] sm:$0xff] %vm694_vm3, %v686_v39  ;;  %v654_v39 = vpop.f32.mrf.mxu3 }
  0xf6   : > { %v612_v42 = vpop.f32.mrf.mxu1  ;;  %v555_v44 = vpop.f32.mrf.mxu2  ;;  %v753_v61 = vld [vmem:[#allocation2 + $0x50] sm:$0xff] }
  0xf7   : > { %710 = vst.msk [vmem:[#allocation2 + $0x58] sm:$0xff] %vm694_vm3, %v671_v41  ;;  %v556_v46 = vadd.f32 %v1532_v52, %v555_v44  ;;  %v769_v1 = vmax.f32 %v1567_v9, %v753_v61 }
  0xf8   : > { %841 = vst.msk [vmem:[#allocation3 + $0xb0] sm:$0xff] %vm694_vm3, %v809_v43  ;;  %v518_v47 = vpop.f32.mrf.mxu0 }
  0xf9   : > { %v519_v48 = vadd.f32 %v1532_v52, %v518_v47  ;;  %v645_v49 = vadd.f32 %v644_v26, %v556_v46 }
  0xfb   : > { %v608_v50 = vadd.f32 %v607_v8, %v519_v48  ;;  %v687_v51 = vmax.f32 %v645_v49, 0.0  ;;  %v536_v49 = vadd.f32 %v1532_v52, %v1540_v2 }
  0xfc   : > { %v761_v11 = vld [vmem:[#allocation2 + $0xd0] sm:$0xff] }
  0xfd   : > { %v672_v53 = vmax.f32 %v608_v50, 0.0  ;;  %726 = vst.msk [vmem:[#allocation2 + $0xd8] sm:$0xff] %vm694_vm3, %v687_v51  ;;  %v777_v16 = vmax.f32 %v1579_v23, %v761_v11 }
  0xfe   : > { %v614_v54 = vpop.f32.mrf.mxu1  ;;  %v558_v55 = vpop.f32.mrf.mxu2  ;;  %v754_v9 = vld [vmem:[#allocation2 + $0x58] sm:$0xff] }
  0xff   : > { %711 = vst.msk [vmem:[#allocation2 + $0x60] sm:$0xff] %vm694_vm3, %v672_v53  ;;  %v559_v56 = vadd.f32 %v1532_v52, %v558_v55  ;;  %v770_v19 = vmax.f32 %v1582_v28, %v754_v9  ;;  %v657_v55 = vpop.f32.mrf.mxu3 }
 0x100   : > { %v520_v57 = vpop.f32.mrf.mxu0 }
 0x101   : > { %v521_v58 = vadd.f32 %v1532_v52, %v520_v57  ;;  %v648_v62 = vadd.f32 %v647_v45, %v559_v56 }
 0x103   : > { %v610_v63 = vadd.f32 %v609_v25, %v521_v58  ;;  %v688_v0 = vmax.f32 %v648_v62, 0.0 }
 0x104   : > { %v762_v29 = vld [vmem:[#allocation2 + $0xd8] sm:$0xff] }
 0x105   : > { %v673_v3 = vmax.f32 %v610_v63, 0.0  ;;  %727 = vst.msk [vmem:[#allocation2 + $0xe0] sm:$0xff] %vm694_vm3, %v688_v0  ;;  %v778_v34 = vmax.f32 %v1594_v40, %v762_v29 }
 0x106   : > { %v617_v4 = vpop.f32.mrf.mxu1  ;;  %v1607_v5 = vld [vmem:[#allocation2 + $0x60] sm:$0xff]  ;;  %v560_v7 = vpop.f32.mrf.mxu2 }
 0x107   : > { %v802_v6 = vmax.f32 %v769_v1, %v1607_v5  ;;  %712 = vst.msk [vmem:[#allocation2 + $0x68] sm:$0xff] %vm694_vm3, %v673_v3  ;;  %v561_v8 = vadd.f32 %v1532_v52, %v560_v7 }
 0x108   : > { %v523_v10 = vpop.f32.mrf.mxu0 }
 0x109   : > { %834 = vst.msk [vmem:[#allocation3 + $0x48] sm:$0xff] %vm694_vm3, %v802_v6  ;;  %v524_v12 = vadd.f32 %v1532_v52, %v523_v10  ;;  %v650_v13 = vadd.f32 %v649_v60, %v561_v8 }
 0x10b   : > { %v613_v14 = vadd.f32 %v612_v42, %v524_v12  ;;  %v689_v17 = vmax.f32 %v650_v13, 0.0  ;;  %v659_v13 = vpop.f32.mrf.mxu3 }
 0x10c   : > { %v1617_v20 = vld [vmem:[#allocation2 + $0xe0] sm:$0xff] }
 0x10d   : > { %v674_v21 = vmax.f32 %v613_v14, 0.0  ;;  %v810_v24 = vmax.f32 %v777_v16, %v1617_v20  ;;  %728 = vst.msk [vmem:[#allocation2 + $0xe8] sm:$0xff] %vm694_vm3, %v689_v17 }
 0x10e   : > { %v619_v22 = vpop.f32.mrf.mxu1  ;;  %v1620_v25 = vld [vmem:[#allocation2 + $0x68] sm:$0xff]  ;;  %v563_v27 = vpop.f32.mrf.mxu2 }
 0x10f   : > { %v803_v26 = vmax.f32 %v770_v19, %v1620_v25  ;;  %713 = vst.msk [vmem:[#allocation2 + $0x70] sm:$0xff] %vm694_vm3, %v674_v21  ;;  %v564_v23 = vadd.f32 %v1532_v52, %v563_v27  ;;  %v849_v21 = vld [vmem:[#allocation3 + $0x27] ss:$2 sm:$0xff] }
 0x110   : > { %842 = vst.msk [vmem:[#allocation3 + $0xc8] sm:$0xff] %vm694_vm3, %v810_v24  ;;  %v525_v28 = vpop.f32.mrf.mxu0 }
 0x111   : > { %835 = vst.msk [vmem:[#allocation3 + $0x50] sm:$0xff] %vm694_vm3, %v803_v26  ;;  %v526_v30 = vadd.f32 %v1532_v52, %v525_v28  ;;  %v653_v31 = vadd.f32 %v652_v15, %v564_v23 }
 0x113   : > { %v615_v32 = vadd.f32 %v614_v54, %v526_v30  ;;  %v690_v35 = vmax.f32 %v653_v31, 0.0  ;;  %v863_v30 = vld [vmem:[#allocation3 + $0x8] ss:$2 sm:$0xff] }
 0x114   : > { %v1632_v37 = vld [vmem:[#allocation2 + $0xe8] sm:$0xff] }
 0x115   : > { %v675_v38 = vmax.f32 %v615_v32, 0.0  ;;  %v811_v42 = vmax.f32 %v778_v34, %v1632_v37  ;;  %729 = vst.msk [vmem:[#allocation2 + $0xf0] sm:$0xff] %vm694_vm3, %v690_v35 }
 0x116   : > { %v622_v41 = vpop.f32.mrf.mxu1  ;;  %v565_v44 = vpop.f32.mrf.mxu2  ;;  %v755_v62 = vld [vmem:[#allocation2 + $0x70] sm:$0xff] }
 0x117   : > { %v623_v43 = vadd.f32 %v622_v41, %v534_v33  ;;  %714 = vst.msk [vmem:[#allocation2 + $0x78] sm:$0xff] %vm694_vm3, %v675_v38  ;;  %v566_v59 = vadd.f32 %v1532_v52, %v565_v44  ;;  %v771_v1 = vmax.f32 %v1607_v5, %v755_v62  ;;  %v897_v62 = vld [vmem:[#allocation3 + $0xa9] ss:$2 sm:$0xff] }
 0x118   : > { %843 = vst.msk [vmem:[#allocation3 + $0xd0] sm:$0xff] %vm694_vm3, %v811_v42  ;;  %v528_v40 = vpop.f32.mrf.mxu0  ;;  %v851_v23 = vld [vmem:[#allocation3 + $0x47] ss:$2 sm:$0xff]  ;;  %v867_v28 = vld [vmem:[#allocation3 + $0x48] ss:$2 sm:$0xff] }
 0x119   : > { %v678_v45 = vmax.f32 %v623_v43, 0.0  ;;  %v529_v46 = vadd.f32 %v1532_v52, %v528_v40  ;;  %v655_v47 = vadd.f32 %v654_v39, %v566_v59  ;;  %v880_v34 = vmax.f32 %v851_v23, %v867_v28  ;;  %v889_v39 = vld [vmem:[#allocation3 + $0x29] ss:$2 sm:$0xff]  ;;  %v873_v43 = vld [vmem:[#allocation3 + $0xa8] ss:$2 sm:$0xff] }
 0x11a   : > { %v857_v42 = vld [vmem:[#allocation3 + $0xa7] ss:$2 sm:$0xff] }
 0x11b   : > { %717 = vst.msk [vmem:[#allocation2 + $0x90] sm:$0xff] %vm694_vm3, %v678_v45  ;;  %v618_v48 = vadd.f32 %v617_v4, %v529_v46  ;;  %v691_v50 = vmax.f32 %v655_v47, 0.0  ;;  %v891_v59 = vld [vmem:[#allocation3 + $0x49] ss:$2 sm:$0xff] }
 0x11c   : > { %v763_v12 = vld [vmem:[#allocation2 + $0xf0] sm:$0xff]  ;;  %v904_v47 = vmax.f32 %v880_v34, %v891_v59 }
 0x11d   : > { %v676_v51 = vmax.f32 %v618_v48, 0.0  ;;  %730 = vst.msk [vmem:[#allocation2 + $0xf8] sm:$0xff] %vm694_vm3, %v691_v50  ;;  %v779_v15 = vmax.f32 %v1617_v20, %v763_v12  ;;  %v887_v40 = vld [vmem:[#allocation3 + $0x9] ss:$2 sm:$0xff]  ;;  %v883_v50 = vmax.f32 %v857_v42, %v873_v43 }
 0x11e   : > { %v624_v53 = vpop.f32.mrf.mxu1  ;;  %v568_v56 = vpop.f32.mrf.mxu2  ;;  %v756_v14 = vld [vmem:[#allocation2 + $0x78] sm:$0xff] }
 0x11f   : > { %v625_v54 = vadd.f32 %v624_v53, %v536_v49  ;;  %715 = vst.msk [vmem:[#allocation2 + $0x80] sm:$0xff] %vm694_vm3, %v676_v51  ;;  %v569_v58 = vadd.f32 %v1532_v52, %v568_v56  ;;  %v772_v17 = vmax.f32 %v1620_v25, %v756_v14  ;;  %v847_v25 = vld [vmem:[#allocation3 + $0x7] ss:$2 sm:$0xff]  ;;  %v875_v33 = vld [vmem:[#allocation3 + $0xc8] ss:$2 sm:$0xff] }
 0x120   : > { %v530_v60 = vpop.f32.mrf.mxu0  ;;  %v859_v32 = vld [vmem:[#allocation3 + $0xc7] ss:$2 sm:$0xff]  ;;  %v878_v38 = vmax.f32 %v847_v25, %v863_v30  ;;  %v1370_v53 = vmov 1983009808   ;;  %v1371_v14 = vmov 1934713408  }
 0x121   : > { %v679_v57 = vmax.f32 %v625_v54, 0.0  ;;  %v531_v61 = vadd.f32 %v1532_v52, %v530_v60  ;;  %v658_v2 = vadd.f32 %v657_v55, %v569_v58  ;;  %v884_v44 = vmax.f32 %v859_v32, %v875_v33  ;;  %v899_v46 = vld [vmem:[#allocation3 + $0xc9] ss:$2 sm:$0xff] }
 0x122   : > { %v757_v4 = vld [vmem:[#allocation2 + $0x90] sm:$0xff]  ;;  %v902_v51 = vmax.f32 %v878_v38, %v887_v40 }
 0x123   : > { %718 = vst.msk [vmem:[#allocation2 + $0x98] sm:$0xff] %vm694_vm3, %v679_v57  ;;  %v620_v63 = vadd.f32 %v619_v22, %v531_v61  ;;  %v692_v0 = vmax.f32 %v658_v2, 0.0  ;;  %v908_v55 = vmax.f32 %v884_v44, %v899_v46 }
 0x124   : > { %v764_v29 = vld [vmem:[#allocation2 + $0xf8] sm:$0xff] }
 0x125   : > { %v677_v3 = vmax.f32 %v620_v63, 0.0  ;;  %731 = vst.msk [vmem:[#allocation2 + $0x100] sm:$0xff] %vm694_vm3, %v692_v0  ;;  %v780_v35 = vmax.f32 %v1632_v37, %v764_v29  ;;  %v916_v37 = vunpack.c.l.s4 %v1370_v53  ;;  %v910_v63 = vrot.slane %v904_v47, 4 }
 0x126   : > { %v741_v6 = vld [vmem:[#allocation2 + $0x80] sm:$0xff]  ;;  %v570_v10 = vpop.f32.mrf.mxu2 }
 0x127   : > { %v773_v7 = vmax.f32 %v741_v6, %v757_v4  ;;  %v804_v8 = vmax.f32 %v771_v1, %v741_v6  ;;  %716 = vst.msk [vmem:[#allocation2 + $0x88] sm:$0xff] %vm694_vm3, %v677_v3  ;;  %v571_v11 = vadd.f32 %v1532_v52, %v570_v10  ;;  %v907_v1 = vmax.f32 %v883_v50, %v897_v62 }
 0x128   : > { %v913_v3 = vrot.slane %v902_v51, 4  ;;  %v917_v4 = vunpack.c.0.s8 %v916_v37  ;;  %v935_v10 = vrot.slane %v908_v55, 4 }
 0x129   : > { %v806_v9 = vmax.f32 %v773_v7, %v1575_v18  ;;  %836 = vst.msk [vmem:[#allocation3 + $0x68] sm:$0xff] %vm694_vm3, %v804_v8  ;;  %v660_v5 = vadd.f32 %v659_v13, %v571_v11  ;;  %v865_v18 = vld [vmem:[#allocation3 + $0x28] ss:$2 sm:$0xff] }
 0x12a   : > { %v758_v22 = vld [vmem:[#allocation2 + $0x98] sm:$0xff]  ;;  %v879_v31 = vmax.f32 %v849_v21, %v865_v18  ;;  %v914_v11 = vsel %vm911_vm4, %v904_v47, %v913_v3 }
 0x12b   : > { %838 = vst.msk [vmem:[#allocation3 + $0x88] sm:$0xff] %vm694_vm3, %v806_v9  ;;  %v693_v16 = vmax.f32 %v660_v5, 0.0  ;;  %v964_v5 = vunpack.c.l.s4 %v1371_v14  ;;  %v922_v18 = vperm.slane %v914_v11, %v917_v4 }
 0x12c   : > { %v796_v19 = vld [vmem:[#allocation2 + $0x100] sm:$0xff]  ;;  %v903_v45 = vmax.f32 %v879_v31, %v889_v39 }
 0x12d   : > { %v812_v24 = vmax.f32 %v779_v15, %v796_v19  ;;  %732 = vst.msk [vmem:[#allocation2 + $0x108] sm:$0xff] %vm694_vm3, %v693_v16  ;;  %v912_v15 = vsel %vm911_vm4, %v910_v63, %v902_v51  ;;  %v965_v32 = vunpack.c.0.s8 %v964_v5  ;;  %v973_v38 = vrot.slane %v922_v18, 4 }
 0x12e   : > { %v742_v52 = vld [vmem:[#allocation2 + $0x88] sm:$0xff]  ;;  %v925_v56 = vrot.slane %v903_v45, 4  ;;  %v918_v28 = vperm.slane %v912_v15, %v917_v4 }
 0x12f   : > { %v774_v26 = vmax.f32 %v742_v52, %v758_v22  ;;  %v805_v27 = vmax.f32 %v772_v17, %v742_v52  ;;  %844 = vst.msk [vmem:[#allocation3 + $0xe8] sm:$0xff] %vm694_vm3, %v812_v24 }
 0x130   : > { %v961_v44 = vrot.slane %v918_v28, 4 }
 0x131   : > { %v807_v20 = vmax.f32 %v774_v26, %v1591_v36  ;;  %837 = vst.msk [vmem:[#allocation3 + $0x70] sm:$0xff] %vm694_vm3, %v805_v27  ;;  %v949_v26 = vrot.slane %v907_v1, 4 }
 0x133   : > { %839 = vst.msk [vmem:[#allocation3 + $0x90] sm:$0xff] %vm694_vm3, %v807_v20 }
 0x134   : > { %v797_v41 = vld [vmem:[#allocation2 + $0x108] sm:$0xff] }
 0x135   : > { %v813_v36 = vmax.f32 %v780_v35, %v797_v41 }
 0x137   : > { %845 = vst.msk [vmem:[#allocation3 + $0xf0] sm:$0xff] %vm694_vm3, %v813_v36 }
 0x138   : > { %v853_v48 = vld [vmem:[#allocation3 + $0x67] ss:$2 sm:$0xff]  ;;  %v869_v49 = vld [vmem:[#allocation3 + $0x68] ss:$2 sm:$0xff] }
 0x139   : > { %v881_v54 = vmax.f32 %v853_v48, %v869_v49  ;;  %v893_v60 = vld [vmem:[#allocation3 + $0x69] ss:$2 sm:$0xff] }
 0x13a   : > { %v855_v57 = vld [vmem:[#allocation3 + $0x87] ss:$2 sm:$0xff]  ;;  %v871_v58 = vld [vmem:[#allocation3 + $0x88] ss:$2 sm:$0xff] }
 0x13b   : > { %v882_v61 = vmax.f32 %v855_v57, %v871_v58  ;;  %v905_v2 = vmax.f32 %v881_v54, %v893_v60  ;;  %v895_v0 = vld [vmem:[#allocation3 + $0x89] ss:$2 sm:$0xff] }
 0x13d   : > { %v906_v6 = vmax.f32 %v882_v61, %v895_v0  ;;  %v926_v7 = vsel %vm911_vm4, %v905_v2, %v925_v56  ;;  %v923_v8 = vrot.slane %v905_v2, 4 }
 0x13e   : > { %v934_v12 = vperm.slane %v926_v7, %v917_v4  ;;  %v861_v9 = vld [vmem:[#allocation3 + $0xe7] ss:$2 sm:$0xff]  ;;  %v877_v13 = vld [vmem:[#allocation3 + $0xe8] ss:$2 sm:$0xff] }
 0x13f   : > { %v924_v16 = vsel %vm911_vm4, %v923_v8, %v903_v45  ;;  %v936_v17 = vsel %vm911_vm4, %v935_v10, %v906_v6  ;;  %v885_v19 = vmax.f32 %v861_v9, %v877_v13  ;;  %v937_v21 = vrot.slane %v906_v6, 4  ;;  %v901_v52 = vld [vmem:[#allocation3 + $0xe9] ss:$2 sm:$0xff] }
 0x140   : > { %v971_v22 = vrot.slane %v934_v12, 4  ;;  %v930_v24 = vperm.slane %v924_v16, %v917_v4  ;;  %v942_v30 = vperm.slane %v936_v17, %v917_v4  ;;  %v974_v46 = vsel %vm911_vm4, %v934_v12, %v973_v38 }
 0x141   : > { %v909_v27 = vmax.f32 %v885_v19, %v901_v52  ;;  %v938_v23 = vsel %vm911_vm4, %v908_v55, %v937_v21  ;;  %v982_v58 = vperm.slane %v974_v46, %v965_v32 }
 0x142   : > { %v959_v29 = vrot.slane %v930_v24, 4  ;;  %v946_v20 = vperm.slane %v938_v23, %v917_v4  ;;  %v972_v25 = vsel %vm911_vm4, %v971_v22, %v922_v18  ;;  %v985_v40 = vrot.slane %v942_v30, 4 }
 0x143   : > { %v950_v31 = vsel %vm911_vm4, %v909_v27, %v949_v26  ;;  %v947_v33 = vrot.slane %v909_v27, 4  ;;  %v978_v41 = vperm.slane %v972_v25, %v965_v32  ;;  %v962_v48 = vsel %vm911_vm4, %v930_v24, %v961_v44 }
 0x144   : > { %v960_v34 = vsel %vm911_vm4, %v959_v29, %v918_v28  ;;  %v958_v35 = vperm.slane %v950_v31, %v917_v4  ;;  %v997_v39 = vrot.slane %v946_v20, 4  ;;  %v970_v60 = vperm.slane %v962_v48, %v965_v32 }
 0x145   : > { %v948_v42 = vsel %vm911_vm4, %v947_v33, %v907_v1  ;;  %v966_v43 = vperm.slane %v960_v34, %v965_v32  ;;  %v1017_v37 = vrot.slane %v978_v41, 4  ;;  %v1021_v8 = vrot.slane %v982_v58, 4 }
 0x146   : > { %v995_v45 = vrot.slane %v958_v35, 4  ;;  %v954_v36 = vperm.slane %v948_v42, %v917_v4  ;;  %v998_v59 = vsel %vm911_vm4, %v958_v35, %v997_v39  ;;  %v1013_v11 = vrot.slane %v970_v60, 4 }
 0x147   : > { %v1006_v47 = vperm.slane %v998_v59, %v965_v32  ;;  %v1009_v57 = vrot.slane %v966_v43, 4 }
 0x148   : > { %v996_v49 = vsel %vm911_vm4, %v995_v45, %v946_v20  ;;  %v983_v50 = vrot.slane %v954_v36, 4  ;;  %v986_v51 = vsel %vm911_vm4, %v954_v36, %v985_v40 }
 0x149   : > { %v1002_v53 = vperm.slane %v996_v49, %v965_v32  ;;  %v1019_v54 = vrot.slane %v1006_v47, 4  ;;  %v994_v55 = vperm.slane %v986_v51, %v965_v32  ;;  %v1022_v10 = vsel %vm911_vm4, %v1006_v47, %v1021_v8 }
 0x14a   : > { %v984_v56 = vsel %vm911_vm4, %v983_v50, %v942_v30 }
 0x14b   : > { %v1015_v61 = vrot.slane %v1002_v53, 4  ;;  %v1018_v62 = vsel %vm911_vm4, %v1002_v53, %v1017_v37  ;;  %v990_v2 = vperm.slane %v984_v56, %v965_v32  ;;  %v1011_v63 = vrot.slane %v994_v55, 4 }
 0x14c   : > { %1032 = vrot.lane.b32.xlu1 %v1018_v62, %s1372_s15  ;;  %v1020_v0 = vsel %vm911_vm4, %v1019_v54, %v982_v58  ;;  %v1014_v12 = vsel %vm911_vm4, %v994_v55, %v1013_v11 }
 0x14d   : > { %v1007_v1 = vrot.slane %v990_v2, 4  ;;  %v1010_v3 = vsel %vm911_vm4, %v990_v2, %v1009_v57  ;;  %v1016_v4 = vsel %vm911_vm4, %v1015_v61, %v978_v41  ;;  %v1012_v6 = vsel %vm911_vm4, %v1011_v63, %v970_v60 }
 0x14e   : > { %1024 = vrot.lane.b32.xlu0 %v1010_v3, %s1372_s15 }
 0x14f   : > { %v1008_v7 = vsel %vm911_vm4, %v1007_v1, %v966_v43 }
 0x154   : > { %1036 = vrot.lane.b32.xlu1 %v1022_v10, %s1372_s15 }
 0x156   : > { %1028 = vrot.lane.b32.xlu0 %v1014_v12, %s1372_s15 }
 0x1be   : > { %v1033_v9 = vpop.permute.xlu1 %1032 }
 0x1bf   : > { %v1041_v13 = vsel %vm694_vm3, %v1016_v4, %v1033_v9 }
 0x1c0   : > { %1045 = vst [vmem:[%s170_s19 + $0x10] sm:$0xff] %v1041_v13  ;;  %v1025_v14 = vpop.permute.xlu0 %1024 }
 0x1c1   : > { %v1039_v5 = vsel %vm694_vm3, %v1008_v7, %v1025_v14 }
 0x1c2   : > { %1043 = vst [vmem:[%s170_s19] sm:$0xff] %v1039_v5 }
 0x1c6   : > { %v1037_v15 = vpop.permute.xlu1 %1036 }
 0x1c7   : > { %v1042_v16 = vsel %vm694_vm3, %v1020_v0, %v1037_v15 }
 0x1c8   : > { %1046 = vst [vmem:[%s170_s19 + $0x18] sm:$0xff] %v1042_v16  ;;  %v1029_v17 = vpop.permute.xlu0 %1028 }
 0x1c9   : > { %v1040_v19 = vsel %vm694_vm3, %v1012_v6, %v1029_v17 }
 0x1ca   : > { %1044 = vst [vmem:[%s170_s19 + $0x8] sm:$0xff] %v1040_v19 }
 0x1cb PF: > { %s13_s12 = sadd.s32 1, %s1366_s12  }
 0x1cc   : > { %p10_p4 = scmp.ge.s32.totalorder %s13_s12, 4  }
 0x1ce   :  { %12 = sbr.rel (!%p10_p4) target bundleno = 1 (0x1), region = 89 }

</bundles_post_ra>
